<compile_context>
chip_gen: v6e
topology: v6e:2x2x1
jax: 0.10.0
libtpu: 0.0.40
codegen_flags: <defaults>
</compile_context>

<pallas_src>
import jax
import jax.numpy as jnp
from jax.experimental import pallas as pl
from jax.experimental.pallas import tpu as pltpu


def _hbm_copy_kernel(x_hbm, o_hbm, sem):
    # One whole-array HBM->HBM DMA.  start() + wait() back-to-back: there is
    # nothing to overlap with in a pure identity, and a single large descriptor
    # already streams at HBM bandwidth on v5e/v6e/v7x.
    cp = pltpu.make_async_copy(x_hbm, o_hbm, sem)
    cp.start()
    cp.wait()


def default_image_feature_forward(image: jax.Array) -> jax.Array:
    """Pallas implementation of DefaultImageFeature.forward (identity copy).

    Shape/dtype agnostic: no grid, no BlockSpec tiling, no VMEM usage beyond the
    DMA semaphore; works for arbitrary ranks and element counts.
    """
    return pl.pallas_call(
        _hbm_copy_kernel,
        out_shape=jax.ShapeDtypeStruct(image.shape, image.dtype),
        in_specs=[pl.BlockSpec(memory_space=pl.ANY)],
        out_specs=pl.BlockSpec(memory_space=pl.ANY),
        scratch_shapes=[pltpu.SemaphoreType.DMA(())],
        compiler_params=pltpu.CompilerParams(has_side_effects=True),
    )(image)


class DefaultImageFeature:
    """JAX mirror of the PyTorch module (no parameters; out_dim == in_dim)."""

    def __init__(self, in_dim: int):
        self.in_dim = in_dim
        self.out_dim = in_dim

    def __call__(self, image: jax.Array) -> jax.Array:
        # NOTE: the mathematically optimal identity path is simply
        # `return image` (no kernel, no HBM traffic).  The explicit Pallas
        # HBM->HBM DMA is used here so the kernel path is exercised end-to-end.
        return default_image_feature_forward(image)


if __name__ == "__main__":
    key = jax.random.PRNGKey(0)

    # Small demo shape matching the module's (batch, num_locations, in_dim) layout.
    B, L, D = 2, 8, 32
    image = jax.random.normal(key, (B, L, D), dtype=jnp.float32)

    module = DefaultImageFeature(in_dim=D)
    out = jax.block_until_ready(module(image))
    assert out.shape == image.shape
    assert out.dtype == image.dtype
    assert bool(jnp.array_equal(out, image))

    # bf16 input (sub-32-bit dtype): the DMA path needs no packed-sublane tiling.
    B2, L2, D2 = 2, 64, 256
    image2 = jax.random.normal(jax.random.PRNGKey(0), (B2, L2, D2), dtype=jnp.bfloat16)
    out2 = jax.block_until_ready(module(image2))
    assert out2.shape == image2.shape
    assert out2.dtype == image2.dtype
    assert bool(jnp.array_equal(out2, image2))

    # Awkward shape (element count NOT a multiple of 128): previously the weak
    # fallback path; now handled identically by the whole-array DMA.
    B3, L3, D3 = 2, 7, 33
    image3 = jax.random.normal(jax.random.PRNGKey(0), (B3, L3, D3), dtype=jnp.float32)
    out3 = jax.block_until_ready(module(image3))
    assert out3.shape == image3.shape
    assert out3.dtype == image3.dtype
    assert bool(jnp.array_equal(out3, image3))

    print("KERNEL_OK")
</pallas_src>

<mosaic_0001>
module attributes {stable_mosaic.version = 11 : i64} {
  func.func @_hbm_copy_kernel(%arg0: memref<2x8x32xf32, #tpu.memory_space<any>>, %arg1: memref<2x8x32xf32, #tpu.memory_space<any>>, %arg2: memref<!tpu.dma_semaphore, #tpu.memory_space<semaphore_mem>>) attributes {dimension_semantics = [], scalar_prefetch = 0 : i64, scratch_operands = 1 : i64, tpu.core_type = #tpu.core_type<tc>} {
    tpu.enqueue_dma source(%arg0 : memref<2x8x32xf32, #tpu.memory_space<any>>) target(%arg1 : memref<2x8x32xf32, #tpu.memory_space<any>>) target_semaphore(%arg2 : memref<!tpu.dma_semaphore, #tpu.memory_space<semaphore_mem>>)
    tpu.wait_dma2 semaphore(%arg2 : memref<!tpu.dma_semaphore, #tpu.memory_space<semaphore_mem>>) src(%arg0 : memref<2x8x32xf32, #tpu.memory_space<any>>) dst(%arg1 : memref<2x8x32xf32, #tpu.memory_space<any>>)
    return
  }
}

</mosaic_0001>

<bundles_post_ra>
// kernel: tpu_custom_call.1
= control target key start
LH: loop header
LB: loop body
LE: loop exit
PB: predicated region body
PF: predicated region fallthrough
CT: control target
= control target key end

     0   :  { %s29_s6 = smov [#allocation2]   ;;  %s30_s7 = smov 131072   ;;  %s48_s0 = inlined_call_operand.hbm [shape: f32[2,8,32], index: 0, kind: input, shape index: {}]   ;;  %s49_s1 = inlined_call_operand.hbm [shape: f32[2,8,32], index: 1, kind: output, shape index: {}]  }
   0x1   :  { %s31_s8 = smov 0  }
   0x2   :  { %12 = dma.general %s48_s0, 256, %s49_s1, %s29_s6, %s30_s7, [#allocation4], %s31_s8, 0  }
   0x3   :  { %27 = dma.done.wait [#allocation2], 256 }
   0x4   :  { %28 = vsyncadd [#allocation2], 4294967040 }
   0x5   :  { %17 = vsyncmov [#allocation2] }
   0x8   :  { %s18_s13 = vpop.sfrf %17 }
   0x9   :  { %p23_p0 = scmp.ne.s32.totalorder %s18_s13, 0 }
   0xb   :  { %22 = shalt.err (%p23_p0)  }

</bundles_post_ra>
